<compile_context>
chip_gen: v5e
topology: v5e:2x2
jax: 0.10.0
libtpu: 0.0.40
codegen_flags: <defaults>
</compile_context>

<pallas_src>
import functools

import jax
import jax.numpy as jnp
from jax import lax
from jax.experimental import pallas as pl
from jax.experimental.pallas import tpu as pltpu


def _round_up(x, m):
    return (x + m - 1) // m * m


def _pad_to(x, rows, cols):
    r, c = x.shape
    if (r, c) == (rows, cols):
        return x
    return jnp.pad(x, ((0, rows - r), (0, cols - c)))


@functools.lru_cache(maxsize=None)
def _preferred_k_tile():
    # v5e's MXU is 128-deep, so 256-deep K tiles only add zero-padding work there;
    # v6e / v7x MXUs are 256-deep and want tk=256 (half the K grid steps).
    try:
        kind = jax.devices()[0].device_kind.lower()
        if "v5 lite" in kind or "v5lite" in kind or "v5e" in kind:
            return 128
    except Exception:
        pass
    return 256


def _pick_tk(K):
    if K <= 128:
        return 128
    return _preferred_k_tile()


def prep_weight(w2d, dtype=jnp.bfloat16):
    """Reshape / cast / pad a [K, N] matmul weight once at setup (loop-invariant)."""
    K, N = w2d.shape
    tk = _pick_tk(K)
    Kp = _round_up(K, tk)
    Np = _round_up(N, 128)
    return {"w": _pad_to(w2d.astype(dtype), Kp, Np), "K": K, "N": N, "tk": tk}


# ----------------------------------------------------------------------------
# Pallas matmul kernels (M/N/K tiled, bf16 operands, f32 accumulation)
# ----------------------------------------------------------------------------
def _matmul_kernel(a_ref, b_ref, o_ref, acc_ref):
    @pl.when(pl.program_id(2) == 0)
    def _():
        acc_ref[...] = jnp.zeros_like(acc_ref)

    acc_ref[...] += jnp.dot(a_ref[...], b_ref[...],
                            preferred_element_type=jnp.float32)

    @pl.when(pl.program_id(2) == pl.num_programs(2) - 1)
    def _():
        o_ref[...] = acc_ref[...].astype(o_ref.dtype)


def _matmul_stats_kernel(a_ref, b_ref, o_ref, sum_ref, ssq_ref, acc_ref):
    """Matmul with BatchNorm column statistics fused into the last-K epilogue."""
    @pl.when(pl.program_id(2) == 0)
    def _():
        acc_ref[...] = jnp.zeros_like(acc_ref)

    acc_ref[...] += jnp.dot(a_ref[...], b_ref[...],
                            preferred_element_type=jnp.float32)

    @pl.when(pl.program_id(2) == pl.num_programs(2) - 1)
    def _():
        acc = acc_ref[...]
        o_ref[...] = acc.astype(o_ref.dtype)
        sum_ref[0] = jnp.sum(acc, axis=0, keepdims=True)        # (1, tn)
        ssq_ref[0] = jnp.sum(acc * acc, axis=0, keepdims=True)  # (1, tn)


def _matmul_aff_stats_kernel(s_ref, b_ref, a_ref, w_ref, o_ref, sum_ref, ssq_ref,
                             acc_ref, *, m_valid, tm):
    """Matmul with the *producer* BatchNorm affine + ReLU folded into the A prologue
    (no separate affine pass over the feature map in HBM), plus fused BN column
    statistics for *this* layer's output in the last-K epilogue."""
    @pl.when(pl.program_id(2) == 0)
    def _():
        acc_ref[...] = jnp.zeros_like(acc_ref)

    a = a_ref[...].astype(jnp.float32)
    a = jnp.maximum(a * s_ref[...] + b_ref[...], 0.0)
    if m_valid is not None:
        # Padded M rows of A are zeros; relu(0*s+b) may be nonzero, so zero them out
        # to keep output rows / BN statistics clean (m_valid is a trace-time int).
        rows = lax.broadcasted_iota(jnp.int32, a.shape, 0) + pl.program_id(0) * tm
        a = jnp.where(rows < m_valid, a, 0.0)
    acc_ref[...] += jnp.dot(a.astype(w_ref.dtype), w_ref[...],
                            preferred_element_type=jnp.float32)

    @pl.when(pl.program_id(2) == pl.num_programs(2) - 1)
    def _():
        acc = acc_ref[...]
        o_ref[...] = acc.astype(o_ref.dtype)
        sum_ref[0] = jnp.sum(acc, axis=0, keepdims=True)
        ssq_ref[0] = jnp.sum(acc * acc, axis=0, keepdims=True)


def pallas_matmul(a, pw, *, scale=None, bias=None, with_stats=False,
                  out_dtype=jnp.bfloat16, a_dtype=jnp.bfloat16):
    """a: [M, K]; pw: prepared weight dict (pre-padded [Kp, Np] + metadata).
    Optional (scale, bias): producer BN affine + ReLU applied to A inside the kernel."""
    M, K = a.shape
    assert K == pw["K"]
    Kp, Np = pw["w"].shape
    N, tk = pw["N"], pw["tk"]
    kt = Kp // tk

    tm = min(256, _round_up(M, 16))
    Mp = _round_up(M, tm)
    mt = Mp // tm
    # N tile: fat (256) when the M axis already provides >=2 parallel blocks,
    # otherwise 128 so the N axis feeds the second TensorCore on v7x.
    if Np <= 128:
        tn = Np
    elif mt >= 2 and Np % 256 == 0:
        tn = 256
    else:
        tn = 128
    nt = Np // tn

    a_p = _pad_to(a.astype(a_dtype), Mp, Kp)

    a_spec = pl.BlockSpec((tm, tk), lambda i, j, k: (i, k))
    b_spec = pl.BlockSpec((tk, tn), lambda i, j, k: (k, j))
    o_spec = pl.BlockSpec((tm, tn), lambda i, j, k: (i, j))
    vec_spec = pl.BlockSpec((1, tk), lambda i, j, k: (0, k))
    stat_spec = pl.BlockSpec((1, 1, tn), lambda i, j, k: (i, 0, j))
    cparams = pltpu.CompilerParams(
        dimension_semantics=("parallel", "parallel", "arbitrary"))
    acc = pltpu.VMEM((tm, tn), jnp.float32)

    if not with_stats:
        out = pl.pallas_call(
            _matmul_kernel,
            out_shape=jax.ShapeDtypeStruct((Mp, Np), out_dtype),
            grid_spec=pltpu.PrefetchScalarGridSpec(
                num_scalar_prefetch=0, grid=(mt, nt, kt),
                in_specs=[a_spec, b_spec], out_specs=o_spec,
                scratch_shapes=[acc]),
            compiler_params=cparams,
        )(a_p, pw["w"])
        return out[:M, :N]

    out_shapes = (jax.ShapeDtypeStruct((Mp, Np), out_dtype),
                  jax.ShapeDtypeStruct((mt, 1, Np), jnp.float32),
                  jax.ShapeDtypeStruct((mt, 1, Np), jnp.float32))
    out_specs = [o_spec, stat_spec, stat_spec]

    if scale is None:
        out, psum, pssq = pl.pallas_call(
            _matmul_stats_kernel,
            out_shape=out_shapes,
            grid_spec=pltpu.PrefetchScalarGridSpec(
                num_scalar_prefetch=0, grid=(mt, nt, kt),
                in_specs=[a_spec, b_spec], out_specs=out_specs,
                scratch_shapes=[acc]),
            compiler_params=cparams,
        )(a_p, pw["w"])
    else:
        s_p = _pad_to(scale.astype(jnp.float32).reshape(1, K), 1, Kp)
        b_p = _pad_to(bias.astype(jnp.float32).reshape(1, K), 1, Kp)
        kern = functools.partial(_matmul_aff_stats_kernel,
                                 m_valid=(M if M % tm else None), tm=tm)
        out, psum, pssq = pl.pallas_call(
            kern,
            out_shape=out_shapes,
            grid_spec=pltpu.PrefetchScalarGridSpec(
                num_scalar_prefetch=0, grid=(mt, nt, kt),
                in_specs=[vec_spec, vec_spec, a_spec, b_spec],
                out_specs=out_specs,
                scratch_shapes=[acc]),
            compiler_params=cparams,
        )(s_p, b_p, a_p, pw["w"])

    col_sum = jnp.sum(psum[:, 0, :N], axis=0)
    col_ssq = jnp.sum(pssq[:, 0, :N], axis=0)
    return out[:M, :N], col_sum, col_ssq


# ----------------------------------------------------------------------------
# Fused elementwise kernels: BN affine + ReLU, and residual add with both BN
# affines fused (main path + shortcut) in one HBM pass.
# ----------------------------------------------------------------------------
def _affine_relu_kernel(x_ref, s_ref, b_ref, o_ref):
    y = x_ref[...].astype(jnp.float32) * s_ref[...] + b_ref[...]
    o_ref[...] = jnp.maximum(y, 0.0).astype(o_ref.dtype)


def _residual_affine_relu_kernel(x_ref, s_ref, b_ref, r_ref, rs_ref, rb_ref, o_ref):
    y = x_ref[...].astype(jnp.float32) * s_ref[...] + b_ref[...]
    y = y + r_ref[...].astype(jnp.float32) * rs_ref[...] + rb_ref[...]
    o_ref[...] = jnp.maximum(y, 0.0).astype(o_ref.dtype)


def apply_affine_relu(x2d, scale, bias, residual=None, res_scale=None, res_bias=None,
                      out_dtype=jnp.bfloat16):
    """relu(x*scale+bias [+ residual*res_scale+res_bias]); x2d/residual: [M, C]."""
    M, C = x2d.shape
    Cp = _round_up(C, 128)
    tm = min(2048, _round_up(M, 16))
    Mp = _round_up(M, tm)
    xp = _pad_to(x2d, Mp, Cp)
    sp = _pad_to(scale.astype(jnp.float32).reshape(1, C), 1, Cp)
    bp = _pad_to(bias.astype(jnp.float32).reshape(1, C), 1, Cp)

    row_spec = pl.BlockSpec((tm, Cp), lambda i: (i, 0))
    vec_spec = pl.BlockSpec((1, Cp), lambda i: (0, 0))

    if residual is None:
        kern = _affine_relu_kernel
        in_specs = [row_spec, vec_spec, vec_spec]
        args = (xp, sp, bp)
    else:
        rp = _pad_to(residual, Mp, Cp)
        rsp = _pad_to(res_scale.astype(jnp.float32).reshape(1, C), 1, Cp)
        rbp = _pad_to(res_bias.astype(jnp.float32).reshape(1, C), 1, Cp)
        kern = _residual_affine_relu_kernel
        in_specs = [row_spec, vec_spec, vec_spec, row_spec, vec_spec, vec_spec]
        args = (xp, sp, bp, rp, rsp, rbp)

    out = pl.pallas_call(
        kern,
        out_shape=jax.ShapeDtypeStruct((Mp, Cp), out_dtype),
        grid_spec=pltpu.PrefetchScalarGridSpec(
            num_scalar_prefetch=0, grid=(Mp // tm,),
            in_specs=in_specs, out_specs=row_spec),
        compiler_params=pltpu.CompilerParams(dimension_semantics=("parallel",)),
    )(*args)
    return out[:M, :C]


# ----------------------------------------------------------------------------
# Layer building blocks (JAX glue around the Pallas kernels)
# ----------------------------------------------------------------------------
def _bn_scale_bias(col_sum, col_ssq, count, gamma, beta, eps=1e-5):
    """Training-mode BatchNorm2d scale/bias from the fused matmul statistics."""
    mean = col_sum / count
    var = jnp.maximum(col_ssq / count - mean * mean, 0.0)   # biased, matches PyTorch
    scale = gamma * lax.rsqrt(var + eps)
    bias = beta - mean * scale
    return scale, bias


def conv3x3(x, pw, stride, prologue=None):
    """x: NHWC input; pw: prepared [9C, Cout] weight; padding=1.
    prologue=(scale, bias): the producer's BN affine + ReLU, applied to the patches
    inside the matmul kernel (x is then the *raw* producer output).
    Returns (raw conv output NHWC, column sum, column sum-of-squares)."""
    N, H, W, C = x.shape
    Ho = (H + 2 - 3) // stride + 1
    Wo = (W + 2 - 3) // stride + 1

    if prologue is None:
        xp = jnp.pad(x, ((0, 0), (1, 1), (1, 1), (0, 0)))
        s_k = b_k = None
    else:
        s, b = prologue
        # The original net zero-pads the *post-activation* map; since the affine+ReLU
        # runs inside the consumer matmul, fill the border with a per-channel value
        # that maps to exactly 0 after relu(v*s + b) (small margin absorbs bf16
        # rounding of the fill value).
        safe_s = jnp.where(jnp.abs(s) < 1e-12, 1.0, s)
        fill = (-(b + 0.01 * jnp.abs(b) + 1e-3) / safe_s).astype(x.dtype)
        xp = jnp.broadcast_to(fill, (N, H + 2, W + 2, C))
        xp = xp.at[:, 1:-1, 1:-1, :].set(x)
        s_k = jnp.tile(s, 9)   # patch columns are ordered (kh, kw, cin)
        b_k = jnp.tile(b, 9)

    # TODO(synk): im2col still materializes the 9 shifted taps in HBM; folding the taps
    # into the matmul's K grid via manual DMA over the padded NHWC slab would cut the
    # remaining conv-input traffic further.
    cols = []
    for kh in range(3):
        for kw in range(3):
            cols.append(xp[:,
                           kh:kh + stride * (Ho - 1) + 1:stride,
                           kw:kw + stride * (Wo - 1) + 1:stride, :])
    patches = jnp.concatenate(cols, axis=-1).reshape(N * Ho * Wo, 9 * C)
    y2d, csum, cssq = pallas_matmul(patches, pw, scale=s_k, bias=b_k, with_stats=True)
    return y2d.reshape(N, Ho, Wo, pw["N"]), csum, cssq


def conv1x1(x, pw, stride):
    """x: NHWC (already activated), pw: prepared [Cin, Cout] weight."""
    xs = x[:, ::stride, ::stride, :]
    N, Ho, Wo, C = xs.shape
    y2d, csum, cssq = pallas_matmul(xs.reshape(-1, C), pw, with_stats=True)
    return y2d.reshape(N, Ho, Wo, pw["N"]), csum, cssq


def maxpool3x3_s2(x):
    """MaxPool2d(kernel_size=3, stride=2, padding=1) on NHWC (runs once; XLA glue)."""
    N, H, W, C = x.shape
    xp = jnp.pad(x, ((0, 0), (1, 1), (1, 1), (0, 0)), constant_values=-jnp.inf)
    Ho = (H + 2 - 3) // 2 + 1
    Wo = (W + 2 - 3) // 2 + 1
    out = None
    for dh in range(3):
        for dw in range(3):
            sl = xp[:, dh:dh + 2 * (Ho - 1) + 1:2, dw:dw + 2 * (Wo - 1) + 1:2, :]
            out = sl if out is None else jnp.maximum(out, sl)
    return out


def residual_block(x, blk):
    stride = blk['stride']
    cout = blk['w2']['N']

    y1, s1, q1 = conv3x3(x, blk['w1'], stride)                       # raw conv1
    cnt1 = float(y1.shape[0] * y1.shape[1] * y1.shape[2])
    sc1, bi1 = _bn_scale_bias(s1, q1, cnt1, blk['g1'], blk['b1'])

    # bn1 + ReLU folded into conv2's A prologue (no extra HBM pass over y1).
    y2, s2, q2 = conv3x3(y1, blk['w2'], 1, prologue=(sc1, bi1))      # raw conv2
    cnt2 = float(y2.shape[0] * y2.shape[1] * y2.shape[2])
    sc2, bi2 = _bn_scale_bias(s2, q2, cnt2, blk['g2'], blk['b2'])

    if 'ws' in blk:
        r, ss, qs = conv1x1(x, blk['ws'], stride)                    # raw shortcut conv
        scS, biS = _bn_scale_bias(ss, qs, cnt2, blk['gs'], blk['bs'])
    else:
        r = x
        scS = jnp.ones((cout,), jnp.float32)
        biS = jnp.zeros((cout,), jnp.float32)

    # out = relu(bn2(conv2) + bn_sc(shortcut)) in one fused elementwise pass.
    out2d = apply_affine_relu(y2.reshape(-1, cout), sc2, bi2,
                              residual=r.reshape(-1, cout),
                              res_scale=scS, res_bias=biS)
    return out2d.reshape(y2.shape)


# ----------------------------------------------------------------------------
# Parameter initialization (deterministic, synthetic) + one-time preparation
# ----------------------------------------------------------------------------
def init_params(key,
                final_output_size=512,
                block_sizes=(2, 2, 2, 1),
                channel_sizes=(64, 64, 128, 256, 512)):
    keys = iter(jax.random.split(key, 128))

    def conv_w(kh, kw, cin, cout):
        return jax.random.normal(next(keys), (kh, kw, cin, cout), jnp.float32) * 0.05

    cs = channel_sizes
    p = {}
    p['stem'] = {
        'w0': conv_w(3, 3, 3, cs[0]), 'g0': jnp.ones(cs[0]), 'b0': jnp.zeros(cs[0]),
        'w1': conv_w(3, 3, cs[0], cs[0]), 'g1': jnp.ones(cs[0]), 'b1': jnp.zeros(cs[0]),
        'w2': conv_w(3, 3, cs[0], cs[0]),
        'g2': jnp.ones(cs[0]), 'b2': jnp.zeros(cs[0]),   # self.bn1 in the torch module
    }

    def make_block(cin, cout, stride):
        blk = {
            'stride': stride,
            'w1': conv_w(3, 3, cin, cout), 'g1': jnp.ones(cout), 'b1': jnp.zeros(cout),
            'w2': conv_w(3, 3, cout, cout), 'g2': jnp.ones(cout), 'b2': jnp.zeros(cout),
        }
        if stride != 1 or cin != cout:
            blk['ws'] = jax.random.normal(next(keys), (cin, cout), jnp.float32) * 0.05
            blk['gs'] = jnp.ones(cout)
            blk['bs'] = jnp.zeros(cout)
        return blk

    def make_layer(cin, cout, n, stride):
        layers = [make_block(cin, cout, stride)]
        for _ in range(1, n):
            layers.append(make_block(cout, cout, 1))
        return layers

    p['layer1'] = make_layer(cs[0], cs[1], block_sizes[0], 1)
    p['layer2'] = make_layer(cs[1], cs[2], block_sizes[1], 2)
    p['layer3'] = make_layer(cs[2], cs[3], block_sizes[2], 2)
    p['layer4'] = make_layer(cs[3], cs[4], block_sizes[3], 2)
    p['fc_w'] = jax.random.normal(next(keys), (cs[-1], final_output_size),
                                  jnp.float32) * 0.02
    p['fc_b'] = jnp.zeros(final_output_size, jnp.float32)
    return p


def prepare_params(p):
    """Pre-reshape / cast to bf16 / pad every matmul weight once (loop-invariant)."""
    def prep3(w):
        k = w.shape[0] * w.shape[1] * w.shape[2]
        return prep_weight(w.reshape(k, w.shape[3]))

    st = p['stem']
    q = {'stem': {'w0': prep3(st['w0']), 'w1': prep3(st['w1']), 'w2': prep3(st['w2']),
                  'g0': st['g0'], 'b0': st['b0'],
                  'g1': st['g1'], 'b1': st['b1'],
                  'g2': st['g2'], 'b2': st['b2']}}
    for name in ('layer1', 'layer2', 'layer3', 'layer4'):
        blks = []
        for blk in p[name]:
            nb = {'stride': blk['stride'],
                  'w1': prep3(blk['w1']), 'g1': blk['g1'], 'b1': blk['b1'],
                  'w2': prep3(blk['w2']), 'g2': blk['g2'], 'b2': blk['b2']}
            if 'ws' in blk:
                nb['ws'] = prep_weight(blk['ws'])
                nb['gs'] = blk['gs']
                nb['bs'] = blk['bs']
            blks.append(nb)
        q[name] = blks
    q['fc_w'] = prep_weight(p['fc_w'], dtype=jnp.float32)
    q['fc_b'] = p['fc_b']
    return q


# ----------------------------------------------------------------------------
# Full forward pass
# ----------------------------------------------------------------------------
def residual_encoder_forward(params, x):
    """params: prepared params (prepare_params).  x: NCHW float32 (extra leading dims
    are flattened into batch, like the torch code).
    Returns (features [N, 512] f32, list of 5 intermediate NCHW f32 feature maps)."""
    if x.ndim != 4:
        x = x.reshape(-1, x.shape[-3], x.shape[-2], x.shape[-1])
    x = jnp.transpose(x, (0, 2, 3, 1)).astype(jnp.bfloat16)   # NCHW -> NHWC, bf16

    st = params['stem']
    y, s, q = conv3x3(x, st['w0'], 1)
    cnt = float(y.shape[0] * y.shape[1] * y.shape[2])
    sc, bi = _bn_scale_bias(s, q, cnt, st['g0'], st['b0'])
    y, s, q = conv3x3(y, st['w1'], 1, prologue=(sc, bi))       # bn0+relu folded in
    cnt = float(y.shape[0] * y.shape[1] * y.shape[2])
    sc, bi = _bn_scale_bias(s, q, cnt, st['g1'], st['b1'])
    y, s, q = conv3x3(y, st['w2'], 2, prologue=(sc, bi))       # bn1'+relu folded in
    cnt = float(y.shape[0] * y.shape[1] * y.shape[2])
    sc, bi = _bn_scale_bias(s, q, cnt, st['g2'], st['b2'])
    c0 = st['w2']['N']
    x = apply_affine_relu(y.reshape(-1, c0), sc, bi).reshape(y.shape)  # bn1 + relu
    x = maxpool3x3_s2(x)

    intermediates = [x]
    for name in ('layer1', 'layer2', 'layer3', 'layer4'):
        for blk in params[name]:
            x = residual_block(x, blk)
        intermediates.append(x)

    # AdaptiveAvgPool2d((1,1)) + flatten + fc (kept in f32)
    feat = jnp.mean(x.astype(jnp.float32), axis=(1, 2))        # [N, 512]
    out = pallas_matmul(feat, params['fc_w'],
                        out_dtype=jnp.float32, a_dtype=jnp.float32) + params['fc_b']

    intermediates_nchw = [jnp.transpose(t, (0, 3, 1, 2)).astype(jnp.float32)
                          for t in intermediates]
    return out, intermediates_nchw


if __name__ == "__main__":
    key = jax.random.PRNGKey(0)
    pkey, xkey = jax.random.split(key)
    params = prepare_params(init_params(pkey))
    x = jax.random.normal(xkey, (2, 3, 16, 16), jnp.float32)   # NCHW like PyTorch

    out, inters = residual_encoder_forward(params, x)
    out = jax.block_until_ready(out)
    for t in inters:
        jax.block_until_ready(t)

    assert out.shape == (2, 512)
    assert inters[0].shape == (2, 64, 4, 4)
    assert inters[-1].shape == (2, 512, 1, 1)
    assert bool(jnp.all(jnp.isfinite(out)))
    print("KERNEL_OK")
</pallas_src>

<mosaic_0001>
module attributes {stable_mosaic.version = 11 : i64} {
  func.func @_matmul_stats_kernel(%arg0: i32, %arg1: i32, %arg2: i32, %arg3: memref<256x128xbf16, #tpu.memory_space<vmem>>, %arg4: memref<128x128xbf16, #tpu.memory_space<vmem>>, %arg5: memref<256x128xbf16, #tpu.memory_space<vmem>>, %arg6: memref<1x1x128xf32, #tpu.memory_space<vmem>>, %arg7: memref<1x1x128xf32, #tpu.memory_space<vmem>>, %arg8: memref<256x128xf32, #tpu.memory_space<vmem>>) attributes {dimension_semantics = [#tpu.dimension_semantics<parallel>, #tpu.dimension_semantics<parallel>, #tpu.dimension_semantics<arbitrary>], iteration_bounds = array<i64: 2, 1, 1>, scalar_prefetch = 0 : i64, scratch_operands = 1 : i64, tpu.core_type = #tpu.core_type<tc>, window_params = [{transform_indices = @transform_0, window_bounds = array<i64: 256, 128>}, {transform_indices = @transform_1, window_bounds = array<i64: 128, 128>}, {transform_indices = @transform_2, window_bounds = array<i64: 256, 128>}, {transform_indices = @transform_3, window_bounds = array<i64: 1, 1, 128>}, {transform_indices = @transform_4, window_bounds = array<i64: 1, 1, 128>}]} {
    %c0_i32 = arith.constant 0 : i32
    %0 = arith.cmpi eq, %arg2, %c0_i32 : i32
    %1 = arith.extui %0 : i1 to i32
    %c0_i32_0 = arith.constant 0 : i32
    %2 = arith.cmpi ne, %1, %c0_i32_0 : i32
    scf.if %2 {
      %cst_10 = arith.constant 0.000000e+00 : f32
      %12 = vector.broadcast %cst_10 : f32 to vector<256x128xf32>
      %c0_11 = arith.constant 0 : index
      %c0_12 = arith.constant 0 : index
      %13 = vector.load %arg8[%c0_11, %c0_12] : memref<256x128xf32, #tpu.memory_space<vmem>>, vector<256x128xf32>
      tpu.vector_store %arg8[%c0_11, %c0_12], %12 {strides = array<i32>} : memref<256x128xf32, #tpu.memory_space<vmem>>, vector<256x128xf32>,
    } else {
    }
    %c0 = arith.constant 0 : index
    %c0_1 = arith.constant 0 : index
    %3 = vector.load %arg8[%c0, %c0_1] : memref<256x128xf32, #tpu.memory_space<vmem>>, vector<256x128xf32>
    %c0_2 = arith.constant 0 : index
    %c0_3 = arith.constant 0 : index
    %4 = vector.load %arg3[%c0_2, %c0_3] : memref<256x128xbf16, #tpu.memory_space<vmem>>, vector<256x128xbf16>
    %c0_4 = arith.constant 0 : index
    %c0_5 = arith.constant 0 : index
    %5 = vector.load %arg4[%c0_4, %c0_5] : memref<128x128xbf16, #tpu.memory_space<vmem>>, vector<128x128xbf16>
    %cst = arith.constant dense<0.000000e+00> : vector<256x128xf32>
    %6 = tpu.matmul %4, %5, %cst {dimension_numbers = #tpu.dot_dimension_numbers<[1], [0], [0], [1], [0, 0, 1, 1], [], []>} : vector<256x128xbf16>, vector<128x128xbf16>, vector<256x128xf32> -> vector<256x128xf32>
    %7 = arith.addf %3, %6 : vector<256x128xf32>
    %c0_6 = arith.constant 0 : index
    %c0_7 = arith.constant 0 : index
    %8 = vector.load %arg8[%c0_6, %c0_7] : memref<256x128xf32, #tpu.memory_space<vmem>>, vector<256x128xf32>
    tpu.vector_store %arg8[%c0_6, %c0_7], %7 {strides = array<i32>} : memref<256x128xf32, #tpu.memory_space<vmem>>, vector<256x128xf32>,
    %c0_i32_8 = arith.constant 0 : i32
    %9 = arith.cmpi eq, %arg2, %c0_i32_8 : i32
    %10 = arith.extui %9 : i1 to i32
    %c0_i32_9 = arith.constant 0 : i32
    %11 = arith.cmpi ne, %10, %c0_i32_9 : i32
    scf.if %11 {
      %c0_10 = arith.constant 0 : index
      %c0_11 = arith.constant 0 : index
      %12 = vector.load %arg8[%c0_10, %c0_11] : memref<256x128xf32, #tpu.memory_space<vmem>>, vector<256x128xf32>
      %13 = arith.truncf %12 : vector<256x128xf32> to vector<256x128xbf16>
      %c0_12 = arith.constant 0 : index
      %c0_13 = arith.constant 0 : index
      %14 = vector.load %arg5[%c0_12, %c0_13] : memref<256x128xbf16, #tpu.memory_space<vmem>>, vector<256x128xbf16>
      tpu.vector_store %arg5[%c0_12, %c0_13], %13 {strides = array<i32>} : memref<256x128xbf16, #tpu.memory_space<vmem>>, vector<256x128xbf16>,
      %cst_14 = arith.constant dense<0.000000e+00> : vector<128xf32>
      %15 = vector.multi_reduction <add>, %12, %cst_14 [0] : vector<256x128xf32> to vector<128xf32>
      %16 = vector.shape_cast %15 : vector<128xf32> to vector<1x128xf32>
      %c0_15 = arith.constant 0 : index
      %c0_16 = arith.constant 0 : index
      %c0_17 = arith.constant 0 : index
      %17 = vector.load %arg6[%c0_15, %c0_16, %c0_17] : memref<1x1x128xf32, #tpu.memory_space<vmem>>, vector<1x1x128xf32>
      %18 = vector.shape_cast %17 : vector<1x1x128xf32> to vector<1x128xf32>
      %19 = vector.shape_cast %16 : vector<1x128xf32> to vector<1x1x128xf32>
      tpu.vector_store %arg6[%c0_15, %c0_16, %c0_17], %19 {strides = array<i32>} : memref<1x1x128xf32, #tpu.memory_space<vmem>>, vector<1x1x128xf32>,
      %20 = arith.mulf %12, %12 : vector<256x128xf32>
      %cst_18 = arith.constant dense<0.000000e+00> : vector<128xf32>
      %21 = vector.multi_reduction <add>, %20, %cst_18 [0] : vector<256x128xf32> to vector<128xf32>
      %22 = vector.shape_cast %21 : vector<128xf32> to vector<1x128xf32>
      %c0_19 = arith.constant 0 : index
      %c0_20 = arith.constant 0 : index
      %c0_21 = arith.constant 0 : index
      %23 = vector.load %arg7[%c0_19, %c0_20, %c0_21] : memref<1x1x128xf32, #tpu.memory_space<vmem>>, vector<1x1x128xf32>
      %24 = vector.shape_cast %23 : vector<1x1x128xf32> to vector<1x128xf32>
      %25 = vector.shape_cast %22 : vector<1x128xf32> to vector<1x1x128xf32>
      tpu.vector_store %arg7[%c0_19, %c0_20, %c0_21], %25 {strides = array<i32>} : memref<1x1x128xf32, #tpu.memory_space<vmem>>, vector<1x1x128xf32>,
    } else {
    }
    return
  }
  func.func @transform_0(%arg0: i32, %arg1: i32, %arg2: i32) -> (i32, i32) {
    %c0_i32 = arith.constant 0 : i32
    return %arg0, %arg2 : i32, i32
  }
  func.func @transform_1(%arg0: i32, %arg1: i32, %arg2: i32) -> (i32, i32) {
    %c0_i32 = arith.constant 0 : i32
    return %arg2, %arg1 : i32, i32
  }
  func.func @transform_2(%arg0: i32, %arg1: i32, %arg2: i32) -> (i32, i32) {
    %c0_i32 = arith.constant 0 : i32
    return %arg0, %arg1 : i32, i32
  }
  func.func @transform_3(%arg0: i32, %arg1: i32, %arg2: i32) -> (i32, i32, i32) {
    %c0_i32 = arith.constant 0 : i32
    %c0_i32_0 = arith.constant 0 : i32
    return %arg0, %c0_i32, %arg1 : i32, i32, i32
  }
  func.func @transform_4(%arg0: i32, %arg1: i32, %arg2: i32) -> (i32, i32, i32) {
    %c0_i32 = arith.constant 0 : i32
    %c0_i32_0 = arith.constant 0 : i32
    return %arg0, %c0_i32, %arg1 : i32, i32, i32
  }
}

</mosaic_0001>

<bundles_post_ra>
// kernel: tpu_custom_call.1
= control target key start
LH: loop header
LB: loop body
LE: loop exit
PB: predicated region body
PF: predicated region fallthrough
CT: control target
= control target key end

     0   :  { %s2090_s0 = inlined_call_operand.hbm [shape: bf16[512,128], index: 0, kind: input, shape index: {}]   ;;  %s2091_s1 = inlined_call_operand.hbm [shape: bf16[128,128], index: 1, kind: input, shape index: {}]   ;;  %s2092_s2 = inlined_call_operand.hbm [shape: bf16[512,128], index: 2, kind: output, shape index: {0}]   ;;  %s2093_s3 = inlined_call_operand.hbm [shape: f32[2,1,128], index: 3, kind: output, shape index: {1}]   ;;  %s2094_s4 = inlined_call_operand.hbm [shape: f32[2,1,128], index: 4, kind: output, shape index: {2}]  }
   0x1   :  { %2099 = sst [smem:[#allocation17_spill]] %s2091_s1 }
   0x2   :  { %10 = vsyncpa [#allocation4], 0 }
   0x3   :  { %12 = vsyncpa [#allocation4 + $0x1], 0 }
   0x4   :  { %13 = vsyncpa [#allocation7], 0 }
   0x5   :  { %14 = vsyncpa [#allocation5], 0 }
   0x6   :  { %16 = vsyncpa [#allocation5 + $0x1], 0 }
   0x7   :  { %17 = vsyncpa [#allocation10], 0 }
   0x8   :  { %19 = vsyncpa [#allocation10 + $0x1], 0  ;;  %s1706_s15 = smov 0   ;;  %s1708_s16 = smov 0  }
   0x9   :  { %s1710_s17 = smov 0   ;;  %s1712_s18 = smov 0  }
   0xa   :  { %s1714_s19 = smov 0   ;;  %s1716_s20 = smov 0  }
   0xb LB: > { %s1737_s21 = sadd.s32 4294967295, %s1674_s20   ;;  %s2095_s22 = sadd.s32 4294967294, %s1674_s20   ;;  %s1674_s20 = sphi %s1716_s20, %s25_s20   ;;  %s1670_s19 = sphi %s1714_s19, %s2115_s19   ;;  %s1666_s18 = sphi %s1712_s18, %s2114_s18   ;;  %s1662_s17 = sphi %s1710_s17, %s2113_s17   ;;  %s1658_s16 = sphi %s1708_s16, %s2112_s16   ;;  %s1654_s15 = sphi %s1706_s15, %s2111_s15  }
   0xc   : > { %p66_p0 = scmp.ne.s32.totalorder %s1658_s16, %s1654_s15  ;;  %p67_p1 = scmp.eq.s32.totalorder %s1737_s21, 0 }
   0xd   : > { %p120_p2 = scmp.eq.s32.totalorder %s1737_s21, 1  ;;  %p126_p3 = scmp.eq.s32.totalorder %s2095_s22, 1 }
   0xe   : > { %p1748_p4 = por %p67_p1, %p66_p0  ;;  %p1125_p5 = scmp.ge.s32.totalorder %s1674_s20, 1 }
   0xf   : > { %p1753_p6 = por %p126_p3, %p66_p0  ;;  %p189_p7 = scmp.lt.s32.totalorder %s1674_s20, 3 }
  0x10   : > { %s2102_s1 = sld [smem:[#allocation17_spill]]  ;;  %s1676_s29 = smov [#allocation6]  }
  0x11   : > { %p1761_p8 = pnand %p1125_p5, %p189_p7  ;;  %s206_s30 = sshll.u32 %s1676_s29, 4  ;;  %s207_s30 = int_to_ptr.vmem [resolvable:$true] %s206_s30 }
  0x12   : > { %p1127_p11 = scmp.ge.s32.totalorder %s1674_s20, 2  ;;  %s2096_s5 = smov 64  }
  0x13   : > { %p1393_p9 = pneg %p1761_p8  ;;  %s2097_s6 = smov 4  }
  0x14   : > { %s44_s7 = sadd.s32 1, %s1670_s19  ;;  %s53_s8 = sadd.s32 1, %s1662_s17 }
  0x15   : > { %p1394_p10 = pnand %p1393_p9, %p67_p1  ;;  %p46_p12 = scmp.ge.s32.totalorder %s44_s7, 2 }
  0x16   : > { %s204_s27 = sshll.u32 %s2102_s1, 4  ;;  %p60_p13 = scmp.ne.s32.totalorder %s1662_s17, %s1658_s16  ;;  %s205_s27 = int_to_ptr.hbm [resolvable:$true] %s204_s27 }
  0x17   : > { %1396 = dma.hbm_to_vmem [thread:$0]  (!%p1394_p10), %s205_s27, 1024, %s207_s30, [#allocation7], %s2096_s5, %s2096_s5, %s2097_s6  }
  0x18   : > { %p61_p0 = scmp.eq.s32.totalorder %s1674_s20, 0  ;;  %s2117_s7 = smov (%p46_p12, %s44_s7), 0 }
  0x19   : > { %2104 = sst [smem:[#allocation16_spill]] %s2117_s7  ;;  %p1786_p5 = por %p120_p2, %p60_p13 }
  0x1a   : > { %p1780_p3 = por %p61_p0, %p60_p13  ;;  %s48_s11 = ssub.s32 %s1670_s19, %s2117_s7 }
  0x1b   : > { %p1412_p7 = scmp.lt.s32.totalorder %s1674_s20, 2  ;;  %p51_p9 = scmp.eq.s32.totalorder %s48_s11, 0 }
  0x1c   : > { %s220_s12 = sand.u32 1, %s1662_s17   ;;  %s1236_s25 = sshll.u32 %s1670_s19, 7 }
  0x1d   : > { %s1128_s13 = sshll.u32 %s220_s12, 7  ;;  %s230_s29 = scalar_lea.hbm %s2090_s0, %s1236_s25 }
  0x1e   : > { %s1795_s14 = scalar_select %p51_p9, %s1662_s17, %s53_s8  }
  0x1f   : > { %s224_s30 = scalar_lea.vmem [#allocation3], %s1128_s13  ;;  %s231_s5 = sshll.u32 %s230_s29, 4  ;;  %s232_s5 = int_to_ptr.hbm [resolvable:$true] %s231_s5 }
  0x20   : > { %s233_s22 = sshll.u32 %s224_s30, 4  ;;  %p1398_p2 = pnand %p1412_p7, %p1780_p3  ;;  %s234_s22 = int_to_ptr.vmem [resolvable:$true] %s233_s22 }
  0x21   : > { %s221_s6 = scalar_lea.sflag [#allocation4], %s220_s12  ;;  %s2107_s1 = smov 4  }
  0x22   : > { %s2108_s7 = smov 64   ;;  %245 = sbr.rel (%p1761_p8) target bundleno = 333 (0x14d), region = 28 }
  0x23   : > { %1400 = dma.hbm_to_vmem [thread:$0]  (!%p1398_p2), %s232_s5, 2048, %s234_s22, %s221_s6, %s2108_s7, %s2108_s7, %s2107_s1  }
  0x24   : > { %s1809_s8 = sand.u32 (!%p1761_p8), 1, %s1658_s16  }
  0x25   : > { %s1132_s11 = sshll.u32 (!%p1761_p8), %s1809_s8, 7  ;;  %s248_s13 = scalar_lea.sflag (!%p1761_p8), [#allocation4], %s1809_s8 }
  0x26   : > { %s1815_s9 = scalar_lea.vmem (!%p1761_p8), [#allocation3], %s1132_s11 }
  0x27   : > { %1637 = dma.done.wait (%p1748_p4), %s248_s13, 2048  }
  0x28   : > { %1639 = vsyncadd (%p1748_p4), %s248_s13, 4294965248 }
  0x29   : > { %1641 = dma.done.wait (%p67_p1), [#allocation7], 1024  }
  0x2a   : > { %1643 = vsyncadd (%p67_p1), [#allocation7], 4294966272  ;;  %v1260_v0 = vld [vmem:[#allocation6 + $0x38] sm:$0xff]  ;;  %v1259_v1 = vld [vmem:[#allocation6 + $0x30] sm:$0xff]  ;;  %s1853_s1 = scalar_lea.vmem [#allocation8], %s1132_s11  ;;  %s1261_s22 = sshll.u32 %s1666_s18, 7 }
  0x2b   : > { %553 = vmatpush.bf16.msra.mxu0 %v1260_v0  ;;  %1357 = vmatpush.bf16.msra.mxu1 %v1260_v0  ;;  %v1258_v2 = vld [vmem:[#allocation6 + $0x28] sm:$0xff]  ;;  %v1257_v3 = vld [vmem:[#allocation6 + $0x20] sm:$0xff]  ;;  %v1256_v4 = vld [vmem:[#allocation6 + $0x18] sm:$0xff]  ;;  %s934_s5 = scalar_lea.hbm %s2092_s2, %s1261_s22  ;;  %s935_s6 = sshll.u32 %s1853_s1, 4  ;;  %s1940_s6 = int_to_ptr.vmem [resolvable:$true] %s935_s6 }
  0x2c   : > { %1358 = vmatpush.bf16.msra.mxu2 %v1260_v0  ;;  %1359 = vmatpush.bf16.msra.mxu3 %v1260_v0  ;;  %v1255_v5 = vld [vmem:[#allocation6 + $0x10] sm:$0xff]  ;;  %v1254_v6 = vld [vmem:[#allocation6 + $0x8] sm:$0xff]  ;;  %v1253_v7 = vld [vmem:[#allocation6] sm:$0xff]  ;;  %s937_s7 = sshll.u32 %s934_s5, 4  ;;  %s914_s12 = scalar_lea.sflag [#allocation5], %s1809_s8  ;;  %s1942_s7 = int_to_ptr.hbm [resolvable:$true] %s937_s7 }
  0x2d   : > { %v1237_v8 = vld [vmem:[%s1815_s9] sm:$0xff]  ;;  %v1238_v12 = vld [vmem:[%s1815_s9 + $0x8] sm:$0xff]  ;;  %v1239_v16 = vld [vmem:[%s1815_s9 + $0x10] sm:$0xff]  ;;  %s1542_s25 = sshra.s32 %s1942_s7, 4  ;;  %s1548_s30 = scalar_lea.hbm %s2092_s2, 256  ;;  %s1543_s25 = int_to_ptr.hbm [resolvable:$true] %s1542_s25 }
  0x2e   : > { %v1241_v9 = vld [vmem:[%s1815_s9 + $0x20] sm:$0xff]  ;;  %v1242_v13 = vld [vmem:[%s1815_s9 + $0x28] sm:$0xff]  ;;  %v1243_v17 = vld [vmem:[%s1815_s9 + $0x30] sm:$0xff]  ;;  %s1544_s26 = scalar_lea.hbm %s1543_s25, 128  ;;  %p1549_p10 = scmp.lt.s32.totalorder %s1543_s25, %s2092_s2 }
  0x2f   : > { %554 = vmatpush.bf16.msra.mxu0 %v1259_v1  ;;  %1360 = vmatpush.bf16.msra.mxu1 %v1259_v1  ;;  %v1245_v10 = vld [vmem:[%s1815_s9 + $0x40] sm:$0xff]  ;;  %v1246_v14 = vld [vmem:[%s1815_s9 + $0x48] sm:$0xff]  ;;  %v1247_v18 = vld [vmem:[%s1815_s9 + $0x50] sm:$0xff]  ;;  %p1545_p1 = scmp.ne.s32.totalorder %s1543_s25, %s1544_s26  ;;  %p1550_p12 = scmp.lt.s32.totalorder %s1548_s30, %s1544_s26 }
  0x30   : > { %1361 = vmatpush.bf16.msra.mxu2 %v1259_v1  ;;  %1362 = vmatpush.bf16.msra.mxu3 %v1259_v1  ;;  %v1249_v11 = vld [vmem:[%s1815_s9 + $0x60] sm:$0xff]  ;;  %v1250_v15 = vld [vmem:[%s1815_s9 + $0x68] sm:$0xff]  ;;  %v1251_v19 = vld [vmem:[%s1815_s9 + $0x70] sm:$0xff] }
  0x31   : > { %v1240_v20 = vld [vmem:[%s1815_s9 + $0x18] sm:$0xff]  ;;  %p1546_p4 = pnand %p1545_p1, %p1786_p5  ;;  %p1551_p13 = por %p1550_p12, %p1549_p10 }
  0x32   : > { %v1244_v21 = vld [vmem:[%s1815_s9 + $0x38] sm:$0xff] }
  0x33   : > { %555 = vmatpush.bf16.msra.mxu0 %v1258_v2  ;;  %1363 = vmatpush.bf16.msra.mxu1 %v1258_v2  ;;  %v1248_v22 = vld [vmem:[%s1815_s9 + $0x58] sm:$0xff]  ;;  %p1547_p8 = pneg %p1546_p4 }
  0x34   : > { %1364 = vmatpush.bf16.msra.mxu2 %v1258_v2  ;;  %1365 = vmatpush.bf16.msra.mxu3 %v1258_v2  ;;  %v1252_v23 = vld [vmem:[%s1815_s9 + $0x78] sm:$0xff] }
  0x35   : > { %p1552_p0 = pnand %p1551_p13, %p1547_p8 }
  0x37   : > { %556 = vmatpush.bf16.msra.mxu0 %v1257_v3  ;;  %1366 = vmatpush.bf16.msra.mxu1 %v1257_v3 }
  0x38   : > { %1367 = vmatpush.bf16.msra.mxu2 %v1257_v3  ;;  %1368 = vmatpush.bf16.msra.mxu3 %v1257_v3 }
  0x3b   : > { %557 = vmatpush.bf16.msra.mxu0 %v1256_v4  ;;  %1369 = vmatpush.bf16.msra.mxu1 %v1256_v4 }
  0x3c   : > { %1370 = vmatpush.bf16.msra.mxu2 %v1256_v4  ;;  %1371 = vmatpush.bf16.msra.mxu3 %v1256_v4 }
  0x3f   : > { %558 = vmatpush.bf16.msra.mxu0 %v1255_v5  ;;  %1372 = vmatpush.bf16.msra.mxu1 %v1255_v5 }
  0x40   : > { %1373 = vmatpush.bf16.msra.mxu2 %v1255_v5  ;;  %1374 = vmatpush.bf16.msra.mxu3 %v1255_v5 }
  0x43   : > { %559 = vmatpush.bf16.msra.mxu0 %v1254_v6  ;;  %1375 = vmatpush.bf16.msra.mxu1 %v1254_v6 }
  0x44   : > { %1376 = vmatpush.bf16.msra.mxu2 %v1254_v6  ;;  %1377 = vmatpush.bf16.msra.mxu3 %v1254_v6 }
  0x47   : > { %560 = vmatpush.bf16.msra.mxu0 %v1253_v7  ;;  %1378 = vmatpush.bf16.msra.mxu1 %v1253_v7 }
  0x48   : > { %1379 = vmatpush.bf16.msra.mxu2 %v1253_v7  ;;  %1380 = vmatpush.bf16.msra.mxu3 %v1253_v7 }
  0x4a   : > { %561 = vmatmul.bf16.vlgmr.msra.gmra.mxu0 %v1237_v8  ;;  %581 = vmatmul.bf16.vlgmr.msra.gmra.mxu1 %v1241_v9 }
  0x4b   : > { %601 = vmatmul.bf16.vlgmr.msra.gmra.mxu2 %v1245_v10  ;;  %621 = vmatmul.bf16.vlgmr.msra.gmra.mxu3 %v1249_v11 }
  0x5a   : > { %566 = vmatmul.bf16.gmra.mxu0 %v1238_v12  ;;  %586 = vmatmul.bf16.gmra.mxu1 %v1242_v13 }
  0x5b   : > { %606 = vmatmul.bf16.gmra.mxu2 %v1246_v14  ;;  %626 = vmatmul.bf16.gmra.mxu3 %v1250_v15 }
  0x6a   : > { %571 = vmatmul.bf16.gmra.mxu0 %v1239_v16  ;;  %591 = vmatmul.bf16.gmra.mxu1 %v1243_v17 }
  0x6b   : > { %611 = vmatmul.bf16.gmra.mxu2 %v1247_v18  ;;  %631 = vmatmul.bf16.gmra.mxu3 %v1251_v19 }
  0x7a   : > { %576 = vmatmul.bf16.gmra.mxu0 %v1240_v20  ;;  %596 = vmatmul.bf16.gmra.mxu1 %v1244_v21 }
  0x7b   : > { %616 = vmatmul.bf16.gmra.mxu2 %v1248_v22  ;;  %636 = vmatmul.bf16.gmra.mxu3 %v1252_v23 }
  0xc7   : > { %v562_v24 = vpop.f32.mrf.mxu0  ;;  %v1841_v25 = vpop.f32.mrf.mxu1 }
  0xc8   : > { %v843_v57 = vmul.f32 %v562_v24, %v562_v24 }
  0xce   : > { %v1843_v26 = vpop.f32.mrf.mxu2  ;;  %v1849_v31 = vpop.f32.mrf.mxu3 }
  0xcf   : > { %v564_v27 = vpop.f32.mrf.mxu0  ;;  %v1845_v28 = vpop.f32.mrf.mxu1 }
  0xd0   : > { %v1265_v29 = vpack.c.bf16 %v564_v27, %v562_v24  ;;  %v1285_v30 = vpack.c.bf16 %v1845_v28, %v1841_v25  ;;  %v844_v56 = vmul.f32 %v564_v27, %v564_v27  ;;  %v805_v59 = vadd.f32 %v564_v27, %v562_v24 }
  0xd1   : > { %v851_v27 = vmul.f32 %v1841_v25, %v1841_v25 }
  0xd2   : > { %1266 = vst [vmem:[%s1853_s1] sm:$0xff] %v1265_v29   ;;  %v875_v60 = vadd.f32 %v844_v56, %v843_v57 }
  0xd3   : > { %1345 = vst [vmem:[%s1853_s1 + $0x20] sm:$0xff] %v1285_v30  }
  0xd6   : > { %v1857_v32 = vpop.f32.mrf.mxu2  ;;  %v1863_v36 = vpop.f32.mrf.mxu3 }
  0xd7   : > { %v567_v33 = vpop.f32.mrf.mxu0  ;;  %v1859_v34 = vpop.f32.mrf.mxu1  ;;  %v1305_v35 = vpack.c.bf16 %v1857_v32, %v1843_v26  ;;  %v1325_v37 = vpack.c.bf16 %v1863_v36, %v1849_v31 }
  0xd8   : > { %v845_v58 = vmul.f32 %v567_v33, %v567_v33  ;;  %v806_v62 = vadd.f32 %v805_v59, %v567_v33 }
  0xd9   : > { %1349 = vst [vmem:[%s1853_s1 + $0x40] sm:$0xff] %v1305_v35  }
  0xda   : > { %1353 = vst [vmem:[%s1853_s1 + $0x60] sm:$0xff] %v1325_v37   ;;  %v876_v0 = vadd.f32 %v875_v60, %v845_v58 }
  0xde   : > { %v1869_v38 = vpop.f32.mrf.mxu2  ;;  %v1875_v43 = vpop.f32.mrf.mxu3 }
  0xdf   : > { %v569_v39 = vpop.f32.mrf.mxu0  ;;  %v1871_v40 = vpop.f32.mrf.mxu1 }
  0xe0   : > { %v1270_v41 = vpack.c.bf16 %v569_v39, %v567_v33  ;;  %v1290_v42 = vpack.c.bf16 %v1871_v40, %v1859_v34  ;;  %v846_v61 = vmul.f32 %v569_v39, %v569_v39  ;;  %v807_v5 = vadd.f32 %v806_v62, %v569_v39 }
  0xe1   : > { %v852_v33 = vmul.f32 %v1845_v28, %v1845_v28  ;;  %v853_v39 = vmul.f32 %v1859_v34, %v1859_v34 }
  0xe2   : > { %1342 = vst [vmem:[%s1853_s1 + $0x8] sm:$0xff] %v1270_v41   ;;  %v877_v7 = vadd.f32 %v876_v0, %v846_v61 }
  0xe3   : > { %1346 = vst [vmem:[%s1853_s1 + $0x28] sm:$0xff] %v1290_v42  }
  0xe6   : > { %v1879_v44 = vpop.f32.mrf.mxu2  ;;  %v1885_v48 = vpop.f32.mrf.mxu3 }
  0xe7   : > { %v572_v45 = vpop.f32.mrf.mxu0  ;;  %v1881_v46 = vpop.f32.mrf.mxu1  ;;  %v1310_v47 = vpack.c.bf16 %v1879_v44, %v1869_v38  ;;  %v1330_v49 = vpack.c.bf16 %v1885_v48, %v1875_v43 }
  0xe8   : > { %v847_v1 = vmul.f32 %v572_v45, %v572_v45  ;;  %v808_v10 = vadd.f32 %v807_v5, %v572_v45 }
  0xe9   : > { %1350 = vst [vmem:[%s1853_s1 + $0x48] sm:$0xff] %v1310_v47   ;;  %v854_v47 = vmul.f32 %v1871_v40, %v1871_v40 }
  0xea   : > { %1354 = vst [vmem:[%s1853_s1 + $0x68] sm:$0xff] %v1330_v49   ;;  %v878_v11 = vadd.f32 %v877_v7, %v847_v1 }
  0xee   : > { %v1891_v50 = vpop.f32.mrf.mxu2  ;;  %v1897_v55 = vpop.f32.mrf.mxu3 }
  0xef   : > { %v574_v51 = vpop.f32.mrf.mxu0  ;;  %v1893_v52 = vpop.f32.mrf.mxu1 }
  0xf0   : > { %v1275_v53 = vpack.c.bf16 %v574_v51, %v572_v45  ;;  %v1295_v54 = vpack.c.bf16 %v1893_v52, %v1881_v46  ;;  %v848_v8 = vmul.f32 %v574_v51, %v574_v51  ;;  %v809_v13 = vadd.f32 %v808_v10, %v574_v51 }
  0xf2   : > { %1343 = vst [vmem:[%s1853_s1 + $0x10] sm:$0xff] %v1275_v53   ;;  %v879_v14 = vadd.f32 %v878_v11, %v848_v8  ;;  %v855_v53 = vmul.f32 %v1881_v46, %v1881_v46 }
  0xf3   : > { %1347 = vst [vmem:[%s1853_s1 + $0x30] sm:$0xff] %v1295_v54  }
  0xf6   : > { %v1901_v63 = vpop.f32.mrf.mxu2  ;;  %v1907_v6 = vpop.f32.mrf.mxu3 }
  0xf7   : > { %v577_v2 = vpop.f32.mrf.mxu0  ;;  %v1903_v3 = vpop.f32.mrf.mxu1  ;;  %v1315_v4 = vpack.c.bf16 %v1901_v63, %v1891_v50  ;;  %v1335_v9 = vpack.c.bf16 %v1907_v6, %v1897_v55 }
  0xf8   : > { %v849_v12 = vmul.f32 %v577_v2, %v577_v2  ;;  %v810_v15 = vadd.f32 %v809_v13, %v577_v2 }
  0xf9   : > { %1351 = vst [vmem:[%s1853_s1 + $0x50] sm:$0xff] %v1315_v4  }
  0xfa   : > { %1355 = vst [vmem:[%s1853_s1 + $0x70] sm:$0xff] %v1335_v9   ;;  %v880_v17 = vadd.f32 %v879_v14, %v849_v12 }
  0xfe   : > { %v1913_v16 = vpop.f32.mrf.mxu2  ;;  %v1917_v24 = vpop.f32.mrf.mxu3 }
  0xff   : > { %v579_v18 = vpop.f32.mrf.mxu0  ;;  %v599_v19 = vpop.f32.mrf.mxu1 }
 0x100   : > { %v1280_v20 = vpack.c.bf16 %v579_v18, %v577_v2  ;;  %v811_v21 = vadd.f32 %v810_v15, %v579_v18  ;;  %v850_v22 = vmul.f32 %v579_v18, %v579_v18  ;;  %v1300_v23 = vpack.c.bf16 %v599_v19, %v1903_v3 }
 0x102   : > { %1344 = vst [vmem:[%s1853_s1 + $0x18] sm:$0xff] %v1280_v20   ;;  %v812_v29 = vadd.f32 %v811_v21, %v1841_v25  ;;  %v881_v30 = vadd.f32 %v880_v17, %v850_v22 }
 0x103   : > { %1348 = vst [vmem:[%s1853_s1 + $0x38] sm:$0xff] %v1300_v23  }
 0x104   : > { %v813_v35 = vadd.f32 %v812_v29, %v1845_v28  ;;  %v882_v37 = vadd.f32 %v881_v30, %v851_v27 }
 0x106   : > { %v814_v25 = vadd.f32 %v813_v35, %v1859_v34  ;;  %v883_v41 = vadd.f32 %v882_v37, %v852_v33  ;;  %v619_v42 = vpop.f32.mrf.mxu2  ;;  %v1938_v51 = vpop.f32.mrf.mxu3 }
 0x107   : > { %v1320_v45 = vpack.c.bf16 %v619_v42, %v1913_v16  ;;  %v1340_v34 = vpack.c.bf16 %v1938_v51, %v1917_v24 }
 0x108   : > { %v884_v49 = vadd.f32 %v883_v41, %v853_v39  ;;  %v815_v28 = vadd.f32 %v814_v25, %v1871_v40  ;;  %v856_v40 = vmul.f32 %v1893_v52, %v1893_v52 }
 0x109   : > { %1352 = vst [vmem:[%s1853_s1 + $0x58] sm:$0xff] %v1320_v45  }
 0x10a   : > { %v816_v54 = vadd.f32 %v815_v28, %v1881_v46  ;;  %v885_v56 = vadd.f32 %v884_v49, %v854_v47  ;;  %1356 = vst [vmem:[%s1853_s1 + $0x78] sm:$0xff] %v1340_v34  }
 0x10c   : > { %v817_v57 = vadd.f32 %v816_v54, %v1893_v52  ;;  %v886_v58 = vadd.f32 %v885_v56, %v855_v53 }
 0x10d   : > { %1555 = shalt.err (!%p1552_p0)
}
 0x10e   : > { %s1679_s9 = smov 64   ;;  %s1680_s1 = smov 4   ;;  %v818_v46 = vadd.f32 %v817_v57, %v1903_v3  ;;  %v857_v52 = vmul.f32 %v1903_v3, %v1903_v3  ;;  %v887_v59 = vadd.f32 %v886_v58, %v856_v40  ;;  %v858_v62 = vmul.f32 %v599_v19, %v599_v19 }
 0x10f   : > { %1387 = dma.vmem_to_hbm [thread:$0]  (%p1786_p5), %s1940_s6, 2048, %s1942_s7, %s914_s12, %s1679_s9, %s1679_s9, %s1680_s1   ;;  %v859_v0 = vmul.f32 %v1843_v26, %v1843_v26  ;;  %v860_v4 = vmul.f32 %v1857_v32, %v1857_v32  ;;  %v861_v8 = vmul.f32 %v1869_v38, %v1869_v38  ;;  %v862_v10 = vmul.f32 %v1879_v44, %v1879_v44 }
 0x110   : > { %v888_v60 = vadd.f32 %v887_v59, %v857_v52  ;;  %v819_v61 = vadd.f32 %v818_v46, %v599_v19  ;;  %v864_v15 = vmul.f32 %v1901_v63, %v1901_v63  ;;  %v865_v19 = vmul.f32 %v1913_v16, %v1913_v16  ;;  %s950_s28 = scalar_lea.hbm %s2093_s3, %s1666_s18  ;;  %s918_s5 = sand.u32 1, %s1737_s21  }
 0x111   : > { %v866_v21 = vmul.f32 %v619_v42, %v619_v42  ;;  %v867_v22 = vmul.f32 %v1849_v31, %v1849_v31  ;;  %v868_v27 = vmul.f32 %v1863_v36, %v1863_v36  ;;  %v869_v30 = vmul.f32 %v1875_v43, %v1875_v43  ;;  %s964_s12 = scalar_lea.hbm %s2094_s4, %s1666_s18  ;;  %s283_s25 = scalar_lea.vmem [#allocation9], %s1809_s8 }
 0x112   : > { %v820_v1 = vadd.f32 %v819_v61, %v1843_v26  ;;  %v889_v2 = vadd.f32 %v888_v60, %v858_v62  ;;  %v863_v26 = vmul.f32 %v1891_v50, %v1891_v50  ;;  %v870_v35 = vmul.f32 %v1885_v48, %v1885_v48  ;;  %s2026_s26 = sshll.u32 %s283_s25, 4  ;;  %s2028_s27 = sshll.u32 %s950_s28, 4  ;;  %s953_s26 = int_to_ptr.vmem [resolvable:$true] %s2026_s26  ;;  %s955_s27 = int_to_ptr.hbm [resolvable:$true] %s2028_s27 }
 0x113   : > { %v874_v28 = vmul.f32 %v1938_v51, %v1938_v51  ;;  %s289_s29 = scalar_lea.vmem [#allocation11], %s1809_s8  ;;  %s2033_s21 = sshll.u32 %s964_s12, 4  ;;  %s969_s21 = int_to_ptr.hbm [resolvable:$true] %s2033_s21 }
 0x114   : > { %v821_v5 = vadd.f32 %v820_v1, %v1857_v32  ;;  %v890_v7 = vadd.f32 %v889_v2, %v859_v0  ;;  %s2031_s30 = sshll.u32 %s289_s29, 4  ;;  %s919_s18 = scalar_lea.sflag [#allocation10], %s918_s5  ;;  %s967_s30 = int_to_ptr.vmem [resolvable:$true] %s2031_s30 }
 0x115   : > { %s1570_s11 = sshra.s32 %s955_s27, 4  ;;  %s1576_s1 = scalar_lea.hbm %s2093_s3, 2  ;;  %s1571_s11 = int_to_ptr.hbm [resolvable:$true] %s1570_s11 }
 0x116   : > { %v822_v3 = vadd.f32 %v821_v5, %v1869_v38  ;;  %v891_v9 = vadd.f32 %v890_v7, %v860_v4  ;;  %s1572_s13 = scalar_lea.hbm %s1571_s11, 1  ;;  %p1577_p2 = scmp.lt.s32.totalorder %s1571_s11, %s2093_s3 }
 0x117   : > { %p1573_p3 = scmp.ne.s32.totalorder %s1571_s11, %s1572_s13  ;;  %p1578_p1 = scmp.lt.s32.totalorder %s1576_s1, %s1572_s13 }
 0x118   : > { %v892_v11 = vadd.f32 %v891_v9, %v861_v8  ;;  %v823_v12 = vadd.f32 %v822_v3, %v1879_v44 }
 0x119   : > { %p1574_p7 = pnand %p1573_p3, %p1786_p5  ;;  %p1579_p4 = por %p1578_p1, %p1577_p2 }
 0x11a   : > { %v824_v13 = vadd.f32 %v823_v12, %v1891_v50  ;;  %v893_v14 = vadd.f32 %v892_v11, %v862_v10 }
 0x11b   : > { %p1575_p9 = pneg %p1574_p7 }
 0x11c   : > { %v825_v32 = vadd.f32 %v824_v13, %v1901_v63  ;;  %v894_v17 = vadd.f32 %v893_v14, %v863_v26 }
 0x11d   : > { %p1580_p8 = pnand %p1579_p4, %p1575_p9 }
 0x11e   : > { %v895_v38 = vadd.f32 %v894_v17, %v864_v15  ;;  %v826_v18 = vadd.f32 %v825_v32, %v1913_v16 }
 0x120   : > { %v896_v20 = vadd.f32 %v895_v38, %v865_v19  ;;  %v827_v44 = vadd.f32 %v826_v18, %v619_v42 }
 0x122   : > { %v828_v50 = vadd.f32 %v827_v44, %v1849_v31  ;;  %v897_v23 = vadd.f32 %v896_v20, %v866_v21  ;;  %v871_v31 = vmul.f32 %v1897_v55, %v1897_v55 }
 0x124   : > { %v829_v63 = vadd.f32 %v828_v50, %v1863_v36  ;;  %v898_v29 = vadd.f32 %v897_v23, %v867_v22 }
 0x126   : > { %v830_v16 = vadd.f32 %v829_v63, %v1875_v43  ;;  %v899_v33 = vadd.f32 %v898_v29, %v868_v27  ;;  %v872_v43 = vmul.f32 %v1907_v6, %v1907_v6 }
 0x128   : > { %v900_v37 = vadd.f32 %v899_v33, %v869_v30  ;;  %v831_v39 = vadd.f32 %v830_v16, %v1885_v48  ;;  %v873_v48 = vmul.f32 %v1917_v24, %v1917_v24 }
 0x12a   : > { %v832_v25 = vadd.f32 %v831_v39, %v1897_v55  ;;  %v901_v41 = vadd.f32 %v900_v37, %v870_v35 }
 0x12c   : > { %v833_v36 = vadd.f32 %v832_v25, %v1907_v6  ;;  %v902_v42 = vadd.f32 %v901_v41, %v871_v31 }
 0x12e   : > { %v903_v45 = vadd.f32 %v902_v42, %v872_v43  ;;  %v834_v47 = vadd.f32 %v833_v36, %v1917_v24 }
 0x130   : > { %v904_v49 = vadd.f32 %v903_v45, %v873_v48  ;;  %v835_v55 = vadd.f32 %v834_v47, %v1938_v51 }
 0x132   : > { %v836_v34 = vrot.slane %v835_v55, 4  ;;  %v905_v53 = vadd.f32 %v904_v49, %v874_v28 }
 0x134   : > { %v837_v54 = vadd.f32 %v836_v34, %v835_v55  ;;  %v906_v6 = vrot.slane %v905_v53, 4 }
 0x136   : > { %v838_v56 = vrot.slane %v837_v54, 2  ;;  %v907_v40 = vadd.f32 %v906_v6, %v905_v53 }
 0x138   : > { %v839_v57 = vadd.f32 %v838_v56, %v837_v54  ;;  %v908_v24 = vrot.slane %v907_v40, 2 }
 0x13a   : > { %v840_v51 = vrot.slane %v839_v57, 1  ;;  %v909_v58 = vadd.f32 %v908_v24, %v907_v40 }
 0x13c   : > { %v841_v46 = vadd.f32 %v840_v51, %v839_v57  ;;  %v910_v52 = vrot.slane %v909_v58, 1 }
 0x13e   : > { %v911_v59 = vadd.f32 %v910_v52, %v909_v58  ;;  %842 = vst [vmem:[%s283_s25] sm:$0x1] %v841_v46 }
 0x13f   : > { %1583 = shalt.err (!%p1580_p8)
}
 0x140   : > { %1388 = dma.vmem_to_hbm [thread:$0]  (%p1786_p5), %s953_s26, 16, %s955_s27, %s919_s18   ;;  %912 = vst [vmem:[%s289_s29] sm:$0x1] %v911_v59 }
 0x141   : > { %s1598_s28 = sshra.s32 %s969_s21, 4  ;;  %s1604_s12 = scalar_lea.hbm %s2094_s4, 2  ;;  %s1599_s28 = int_to_ptr.hbm [resolvable:$true] %s1598_s28 }
 0x142   : > { %s1600_s5 = scalar_lea.hbm %s1599_s28, 1  ;;  %p1605_p0 = scmp.lt.s32.totalorder %s1599_s28, %s2094_s4 }
 0x143   : > { %p1601_p10 = scmp.ne.s32.totalorder %s1599_s28, %s1600_s5  ;;  %p1606_p3 = scmp.lt.s32.totalorder %s1604_s12, %s1600_s5 }
 0x145   : > { %p1602_p12 = pnand %p1601_p10, %p1786_p5  ;;  %p1607_p7 = por %p1606_p3, %p1605_p0 }
 0x147   : > { %p1603_p13 = pneg %p1602_p12 }
 0x149   : > { %p1608_p9 = pnand %p1607_p7, %p1603_p13 }
 0x14b   : > { %1611 = shalt.err (!%p1608_p9)
}
 0x14c   : > { %1389 = dma.vmem_to_hbm [thread:$0]  (%p1786_p5), %s967_s30, 16, %s969_s21, %s919_s18  }
 0x14d PF: > { %s980_s26 = sand.u32 1, %s1654_s15   ;;  %p1402_p2 = pnand %p1127_p11, %p1753_p6 }
 0x14e   : > { %s981_s27 = scalar_lea.sflag [#allocation5], %s980_s26 }
 0x14f   : > { %p1403_p1 = pneg %p1402_p2 }
 0x151   : > { %1645 = dma.done.wait (%p1403_p1), %s981_s27, 2048  }
 0x152   : > { %1647 = vsyncadd (%p1403_p1), %s981_s27, 4294965248  ;;  %s2109_s29 = sadd.s32 4294967294, %s1674_s20  }
 0x153   : > { %s990_s10 = sand.u32 1, %s2109_s29  }
 0x154   : > { %s991_s13 = scalar_lea.sflag [#allocation10], %s990_s10 }
 0x155   : > { %1649 = dma.done.wait (%p1403_p1), %s991_s13, 32  }
 0x156   : > { %1651 = vsyncadd (%p1403_p1), %s991_s13, 4294967264  ;;  %s25_s20 = sadd.s32 1, %s1674_s20   ;;  %s2110_s24 = sld [smem:[#allocation16_spill]] }
 0x157   : > { %p22_p5 = scmp.ge.s32.totalorder %s25_s20, 4   ;;  %s2111_s15 = smov %s1658_s16 }
 0x158   : > { %s2112_s16 = smov %s1662_s17  ;;  %s2113_s17 = smov %s1795_s14 }
 0x159   : > { %s2114_s18 = smov %s1670_s19  ;;  %24 = sbr.rel (!%p22_p5) target bundleno = 11 (0xb), region = 118 }
 0x15c   : > { %s2115_s19 = smov %s2110_s24 }
 0x15e   :  { %1005 = vsyncpa [#allocation4], 1 }
 0x15f   :  { %1007 = vsyncpa [#allocation4 + $0x1], 1 }
 0x160   :  { %1008 = vsyncpa [#allocation7], 1 }
 0x161   :  { %1009 = vsyncpa [#allocation5], 1 }
 0x162   :  { %1011 = vsyncpa [#allocation5 + $0x1], 1 }
 0x163   :  { %1012 = vsyncpa [#allocation10], 1 }
 0x164   :  { %1014 = vsyncpa [#allocation10 + $0x1], 1 }

</bundles_post_ra>
